<compile_context>
chip_gen: v6e
topology: v6e:2x2x1
jax: 0.10.0
libtpu: 0.0.40
codegen_flags: <defaults>
</compile_context>

<pallas_src>
import math
import jax
import jax.numpy as jnp
from jax.experimental import pallas as pl
from jax.experimental.pallas import tpu as pltpu

_INV_SQRT2 = 1.0 / math.sqrt(2.0)
_MiB = 1024 * 1024


def _round_up(x, m):
    return ((x + m - 1) // m) * m


def _tpu_generation():
    """Best-effort chip-generation / VMEM-capacity detection (never raises)."""
    kind = ""
    try:
        kind = jax.devices()[0].device_kind.lower()
    except Exception:
        pass
    is_v5e = ("v5 lite" in kind) or ("v5e" in kind) or ("v5lite" in kind)
    is_v7 = "v7" in kind
    vmem_cap = None
    try:
        info = pltpu.get_tpu_info()
        vmem_cap = int(getattr(info, "vmem_capacity_bytes", 0)) or None
    except Exception:
        vmem_cap = None
    if vmem_cap is None:
        # v7x has 64 MiB / TensorCore; v5e / v6e have 128 MiB.  Unknown -> be
        # conservative.
        vmem_cap = 64 * _MiB if (is_v7 or not kind) else 128 * _MiB
    return is_v5e, is_v7, vmem_cap


def _vmem_estimate(tm, tf, tn, d_model, itemsize):
    est = 2 * tm * d_model * itemsize        # x tile (double-buffered)
    est += 2 * d_model * tf * itemsize       # W1 tile
    est += 2 * 8 * tf * itemsize             # b1 tile (sublane-padded)
    est += 2 * tf * tn * itemsize            # W2 tile
    est += 2 * 8 * tn * itemsize             # b2 tile
    est += 2 * tm * tn * itemsize            # out tile
    est += tm * tn * 4                       # f32 accumulator scratch
    return est


def _ffn_kernel(x_ref, w1_ref, b1_ref, w2_ref, b2_ref, o_ref, acc_ref):
    k = pl.program_id(2)

    # Initialize the accumulator with b2 so the epilogue is a bare store.
    @pl.when(k == 0)
    def _():
        acc_ref[...] = jnp.broadcast_to(
            b2_ref[...].astype(jnp.float32), acc_ref.shape)

    # fc1 partial: (tm, d_model) @ (d_model, tf); native-dtype in, f32 accumulate.
    h = jnp.dot(x_ref[...], w1_ref[...], preferred_element_type=jnp.float32)
    h = h + b1_ref[...].astype(jnp.float32)

    # Exact GELU (erf form) -- matches torch.nn.GELU() default numerics.
    g = 0.5 * h * (1.0 + jax.lax.erf(h * _INV_SQRT2))

    # fc2 partial: (tm, tf) @ (tf, tn), accumulated in f32 scratch.
    acc_ref[...] += jnp.dot(g.astype(w2_ref.dtype), w2_ref[...],
                            preferred_element_type=jnp.float32)

    @pl.when(k == pl.num_programs(2) - 1)
    def _():
        o_ref[...] = acc_ref[...].astype(o_ref.dtype)


def ffn_pallas(x, w1, b1, w2, b2, *, tm=None, tf=None, compute_dtype=None):
    """x: (B, S, d_model); w1: (d_model, d_ffn); b1: (d_ffn,);
       w2: (d_ffn, d_model); b2: (d_model,).  Weights are pre-transposed to
       (in, out) so the kernel does plain x @ W on the MXU.

       compute_dtype: optionally cast x/W1/W2 (e.g. jnp.bfloat16) before the
       kernel; accumulation stays f32.  Default None preserves input dtype."""
    B, S, d_model = x.shape
    d_ffn = w1.shape[1]
    M = B * S

    is_v5e, is_v7, vmem_cap = _tpu_generation()

    # ---- generation-aware tile targets (weight stream needs ~tm flops/byte) ----
    if tm is None:
        tm = 384 if is_v5e else (512 if is_v7 else 768)   # multiples of 128/256
    if tf is None:
        tf = 256 if is_v7 else 512

    # Row tile: multiple of 8 sublanes, no larger than the (padded) row count.
    # (If M >= target, tm stays the MXU-aligned target; if M is small, one tile
    # covers all rows -- rounding further up would only add padded MXU passes.)
    tm = min(tm, _round_up(M, 8))
    tm = _round_up(tm, 8)

    # d_ffn tile: multiple of 128 lanes, no larger than the (padded) d_ffn.
    tf = min(tf, _round_up(d_ffn, 128))
    tf = _round_up(tf, 128)

    # Output-column tile.  Default: full d_model.  On v7x with a single row
    # tile (small M) split d_model so both TensorCores get a parallel tile.
    tn = d_model
    if is_v7 and (_round_up(M, tm) // tm) < 2 and d_model % 256 == 0:
        tn = d_model // 2

    # ---- generation-aware VMEM limit + tile fit loop ----
    itemsize = jnp.dtype(compute_dtype or x.dtype).itemsize
    vmem_limit = max(32 * _MiB, min(vmem_cap - 16 * _MiB, vmem_cap))
    budget = vmem_limit - 4 * _MiB    # slack for compiler-internal scratch
    min_tm = min(tm, 128 if is_v5e else 256)
    while _vmem_estimate(tm, tf, tn, d_model, itemsize) > budget:
        if tf > 128:
            tf = max(128, tf // 2)
        elif tn % 256 == 0 and d_model % (tn // 2) == 0:
            tn = tn // 2
        elif tm > min_tm:
            tm = max(min_tm, _round_up(tm // 2, 8))
        else:
            break

    M_pad = _round_up(M, tm)
    F_pad = _round_up(d_ffn, tf)
    n_i = M_pad // tm
    n_n = d_model // tn
    n_k = F_pad // tf

    # ---- prepare (padded / optionally cast) operands ----
    x2 = x.reshape(M, d_model)
    w1p, b1p, w2p = w1, b1, w2
    if compute_dtype is not None:
        x2 = x2.astype(compute_dtype)
        w1p = w1p.astype(compute_dtype)
        w2p = w2p.astype(compute_dtype)
    if M_pad != M:
        x2 = jnp.pad(x2, ((0, M_pad - M), (0, 0)))
    if F_pad != d_ffn:
        # zero-pad along d_ffn: GELU(0) == 0 and zero rows of W2 add nothing.
        w1p = jnp.pad(w1p, ((0, 0), (0, F_pad - d_ffn)))
        b1p = jnp.pad(b1p, ((0, F_pad - d_ffn),))
        w2p = jnp.pad(w2p, ((0, F_pad - d_ffn), (0, 0)))
    b1_2 = b1p.reshape(1, F_pad)
    b2_2 = b2.reshape(1, d_model)

    # ---- advisory cost estimate (counts weight re-streaming + output write) ----
    cost = pl.CostEstimate(
        flops=2 * M_pad * d_model * F_pad * (n_n + 1),
        transcendentals=M_pad * F_pad * n_n,
        bytes_accessed=(
            M_pad * d_model * itemsize                       # x read (per i tile)
            + n_i * n_n * d_model * F_pad * itemsize         # W1 re-streamed
            + n_i * F_pad * d_model * itemsize               # W2 re-streamed
            + M_pad * d_model * itemsize                     # output write
            + F_pad * itemsize + d_model * itemsize),        # biases
    )

    out2 = pl.pallas_call(
        _ffn_kernel,
        out_shape=jax.ShapeDtypeStruct((M_pad, d_model), x.dtype),
        grid_spec=pltpu.PrefetchScalarGridSpec(
            num_scalar_prefetch=0,
            grid=(n_i, n_n, n_k),
            in_specs=[
                pl.BlockSpec((tm, d_model), lambda i, n, k: (i, 0)),  # x rows (resident)
                pl.BlockSpec((d_model, tf), lambda i, n, k: (0, k)),  # W1 col tile
                pl.BlockSpec((1, tf), lambda i, n, k: (0, k)),        # b1 tile
                pl.BlockSpec((tf, tn), lambda i, n, k: (k, n)),       # W2 tile
                pl.BlockSpec((1, tn), lambda i, n, k: (0, n)),        # b2 tile
            ],
            out_specs=pl.BlockSpec((tm, tn), lambda i, n, k: (i, n)),
            scratch_shapes=[pltpu.VMEM((tm, tn), jnp.float32)],
        ),
        compiler_params=pltpu.CompilerParams(
            dimension_semantics=("parallel", "parallel", "arbitrary"),
            vmem_limit_bytes=int(vmem_limit),
        ),
        cost_estimate=cost,
    )(x2, w1p, b1_2, w2p, b2_2)

    return out2[:M].reshape(B, S, d_model)


def _init_params(key, d_model, d_ffn, dtype=jnp.float32):
    # Deterministic synthetic init (mimics nn.Linear's uniform(-1/sqrt(fan_in), .)).
    k1, k2, k3, k4 = jax.random.split(key, 4)
    lim1 = 1.0 / math.sqrt(d_model)
    lim2 = 1.0 / math.sqrt(d_ffn)
    # stored already transposed: (in, out)
    w1 = jax.random.uniform(k1, (d_model, d_ffn), dtype, -lim1, lim1)
    b1 = jax.random.uniform(k2, (d_ffn,), dtype, -lim1, lim1)
    w2 = jax.random.uniform(k3, (d_ffn, d_model), dtype, -lim2, lim2)
    b2 = jax.random.uniform(k4, (d_model,), dtype, -lim2, lim2)
    return w1, b1, w2, b2


def _ffn_reference(x, w1, b1, w2, b2):
    h = x @ w1 + b1
    g = 0.5 * h * (1.0 + jax.lax.erf(h * _INV_SQRT2))
    return g @ w2 + b2


if __name__ == "__main__":
    # Small shapes consistent with the module defaults: batch=2, seq=8,
    # d_model=512, d_ffn=128.
    B, S, d_model, d_ffn = 2, 8, 512, 128
    key = jax.random.PRNGKey(0)
    kx, kp = jax.random.split(key)
    x = jax.random.normal(kx, (B, S, d_model), jnp.float32)
    w1, b1, w2, b2 = _init_params(kp, d_model, d_ffn)

    out = ffn_pallas(x, w1, b1, w2, b2)
    out = jax.block_until_ready(out)

    ref = _ffn_reference(x, w1, b1, w2, b2)
    assert out.shape == (B, S, d_model)
    assert jnp.allclose(out, ref, atol=1e-4, rtol=1e-4)

    print("KERNEL_OK")
</pallas_src>

<mosaic_0001>
module attributes {stable_mosaic.version = 11 : i64} {
  func.func @_ffn_kernel(%arg0: i32, %arg1: i32, %arg2: i32, %arg3: memref<16x512xf32, #tpu.memory_space<vmem>>, %arg4: memref<512x128xf32, #tpu.memory_space<vmem>>, %arg5: memref<1x128xf32, #tpu.memory_space<vmem>>, %arg6: memref<128x512xf32, #tpu.memory_space<vmem>>, %arg7: memref<1x512xf32, #tpu.memory_space<vmem>>, %arg8: memref<16x512xf32, #tpu.memory_space<vmem>>, %arg9: memref<16x512xf32, #tpu.memory_space<vmem>>) attributes {dimension_semantics = [#tpu.dimension_semantics<parallel>, #tpu.dimension_semantics<parallel>, #tpu.dimension_semantics<arbitrary>], iteration_bounds = array<i64: 1, 1, 1>, scalar_prefetch = 0 : i64, scratch_operands = 1 : i64, tpu.core_type = #tpu.core_type<tc>, window_params = [{transform_indices = @transform_0, window_bounds = array<i64: 16, 512>}, {transform_indices = @transform_1, window_bounds = array<i64: 512, 128>}, {transform_indices = @transform_2, window_bounds = array<i64: 1, 128>}, {transform_indices = @transform_3, window_bounds = array<i64: 128, 512>}, {transform_indices = @transform_4, window_bounds = array<i64: 1, 512>}, {transform_indices = @transform_5, window_bounds = array<i64: 16, 512>}]} {
    %c0_i32 = arith.constant 0 : i32
    %0 = arith.cmpi eq, %arg2, %c0_i32 : i32
    %1 = arith.extui %0 : i1 to i32
    %c0_i32_0 = arith.constant 0 : i32
    %2 = arith.cmpi ne, %1, %c0_i32_0 : i32
    scf.if %2 {
      %c0_18 = arith.constant 0 : index
      %c0_19 = arith.constant 0 : index
      %25 = vector.load %arg7[%c0_18, %c0_19] : memref<1x512xf32, #tpu.memory_space<vmem>>, vector<1x512xf32>
      %26 = vector.shape_cast %25 : vector<1x512xf32> to vector<1x512xf32>
      %27 = vector.broadcast %26 : vector<1x512xf32> to vector<16x512xf32>
      %c0_20 = arith.constant 0 : index
      %c0_21 = arith.constant 0 : index
      %28 = vector.load %arg9[%c0_20, %c0_21] : memref<16x512xf32, #tpu.memory_space<vmem>>, vector<16x512xf32>
      tpu.vector_store %arg9[%c0_20, %c0_21], %27 {strides = array<i32>} : memref<16x512xf32, #tpu.memory_space<vmem>>, vector<16x512xf32>,
    } else {
    }
    %c0 = arith.constant 0 : index
    %c0_1 = arith.constant 0 : index
    %3 = vector.load %arg3[%c0, %c0_1] : memref<16x512xf32, #tpu.memory_space<vmem>>, vector<16x512xf32>
    %c0_2 = arith.constant 0 : index
    %c0_3 = arith.constant 0 : index
    %4 = vector.load %arg4[%c0_2, %c0_3] : memref<512x128xf32, #tpu.memory_space<vmem>>, vector<512x128xf32>
    %cst = arith.constant dense<0.000000e+00> : vector<16x128xf32>
    %5 = tpu.matmul %3, %4, %cst {dimension_numbers = #tpu.dot_dimension_numbers<[1], [0], [0], [1], [0, 0, 1, 1], [], []>} : vector<16x512xf32>, vector<512x128xf32>, vector<16x128xf32> -> vector<16x128xf32>
    %c0_4 = arith.constant 0 : index
    %c0_5 = arith.constant 0 : index
    %6 = vector.load %arg5[%c0_4, %c0_5] : memref<1x128xf32, #tpu.memory_space<vmem>>, vector<1x128xf32>
    %7 = vector.broadcast %6 : vector<1x128xf32> to vector<16x128xf32>
    %8 = arith.addf %5, %7 : vector<16x128xf32>
    %cst_6 = arith.constant 5.000000e-01 : f32
    %9 = vector.broadcast %cst_6 : f32 to vector<16x128xf32>
    %10 = arith.mulf %9, %8 : vector<16x128xf32>
    %cst_7 = arith.constant 0.707106769 : f32
    %11 = vector.broadcast %cst_7 : f32 to vector<16x128xf32>
    %12 = arith.mulf %8, %11 : vector<16x128xf32>
    %13 = math.erf %12 : vector<16x128xf32>
    %cst_8 = arith.constant 1.000000e+00 : f32
    %14 = vector.broadcast %cst_8 : f32 to vector<16x128xf32>
    %15 = arith.addf %14, %13 : vector<16x128xf32>
    %16 = arith.mulf %10, %15 : vector<16x128xf32>
    %c0_9 = arith.constant 0 : index
    %c0_10 = arith.constant 0 : index
    %17 = vector.load %arg9[%c0_9, %c0_10] : memref<16x512xf32, #tpu.memory_space<vmem>>, vector<16x512xf32>
    %c0_11 = arith.constant 0 : index
    %c0_12 = arith.constant 0 : index
    %18 = vector.load %arg6[%c0_11, %c0_12] : memref<128x512xf32, #tpu.memory_space<vmem>>, vector<128x512xf32>
    %cst_13 = arith.constant dense<0.000000e+00> : vector<16x512xf32>
    %19 = tpu.matmul %16, %18, %cst_13 {dimension_numbers = #tpu.dot_dimension_numbers<[1], [0], [0], [1], [0, 0, 1, 1], [], []>} : vector<16x128xf32>, vector<128x512xf32>, vector<16x512xf32> -> vector<16x512xf32>
    %20 = arith.addf %17, %19 : vector<16x512xf32>
    %c0_14 = arith.constant 0 : index
    %c0_15 = arith.constant 0 : index
    %21 = vector.load %arg9[%c0_14, %c0_15] : memref<16x512xf32, #tpu.memory_space<vmem>>, vector<16x512xf32>
    tpu.vector_store %arg9[%c0_14, %c0_15], %20 {strides = array<i32>} : memref<16x512xf32, #tpu.memory_space<vmem>>, vector<16x512xf32>,
    %c0_i32_16 = arith.constant 0 : i32
    %22 = arith.cmpi eq, %arg2, %c0_i32_16 : i32
    %23 = arith.extui %22 : i1 to i32
    %c0_i32_17 = arith.constant 0 : i32
    %24 = arith.cmpi ne, %23, %c0_i32_17 : i32
    scf.if %24 {
      %c0_18 = arith.constant 0 : index
      %c0_19 = arith.constant 0 : index
      %25 = vector.load %arg9[%c0_18, %c0_19] : memref<16x512xf32, #tpu.memory_space<vmem>>, vector<16x512xf32>
      %c0_20 = arith.constant 0 : index
      %c0_21 = arith.constant 0 : index
      %26 = vector.load %arg8[%c0_20, %c0_21] : memref<16x512xf32, #tpu.memory_space<vmem>>, vector<16x512xf32>
      tpu.vector_store %arg8[%c0_20, %c0_21], %25 {strides = array<i32>} : memref<16x512xf32, #tpu.memory_space<vmem>>, vector<16x512xf32>,
    } else {
    }
    return
  }
  func.func @transform_0(%arg0: i32, %arg1: i32, %arg2: i32) -> (i32, i32) {
    %c0_i32 = arith.constant 0 : i32
    %c0_i32_0 = arith.constant 0 : i32
    return %arg0, %c0_i32 : i32, i32
  }
  func.func @transform_1(%arg0: i32, %arg1: i32, %arg2: i32) -> (i32, i32) {
    %c0_i32 = arith.constant 0 : i32
    %c0_i32_0 = arith.constant 0 : i32
    return %c0_i32, %arg2 : i32, i32
  }
  func.func @transform_2(%arg0: i32, %arg1: i32, %arg2: i32) -> (i32, i32) {
    %c0_i32 = arith.constant 0 : i32
    %c0_i32_0 = arith.constant 0 : i32
    return %c0_i32, %arg2 : i32, i32
  }
  func.func @transform_3(%arg0: i32, %arg1: i32, %arg2: i32) -> (i32, i32) {
    %c0_i32 = arith.constant 0 : i32
    return %arg2, %arg1 : i32, i32
  }
  func.func @transform_4(%arg0: i32, %arg1: i32, %arg2: i32) -> (i32, i32) {
    %c0_i32 = arith.constant 0 : i32
    %c0_i32_0 = arith.constant 0 : i32
    return %c0_i32, %arg1 : i32, i32
  }
  func.func @transform_5(%arg0: i32, %arg1: i32, %arg2: i32) -> (i32, i32) {
    %c0_i32 = arith.constant 0 : i32
    return %arg0, %arg1 : i32, i32
  }
}

</mosaic_0001>

<bundles_post_ra>
// kernel: tpu_custom_call.1
= control target key start
LH: loop header
LB: loop body
LE: loop exit
PB: predicated region body
PF: predicated region fallthrough
CT: control target
= control target key end

     0   :  { %10 = vsyncpa [#allocation4], 0  ;;  %s856_s0 = inlined_call_operand.hbm [shape: f32[16,512], index: 0, kind: input, shape index: {}]   ;;  %s857_s1 = inlined_call_operand.hbm [shape: f32[512,128], index: 1, kind: input, shape index: {}]   ;;  %s858_s2 = inlined_call_operand.vmem [shape: f32[1,128], index: 2, kind: input, shape index: {}]   ;;  %s859_s3 = inlined_call_operand.hbm [shape: f32[128,512], index: 3, kind: input, shape index: {}]   ;;  %s860_s4 = inlined_call_operand.vmem [shape: f32[1,512], index: 4, kind: input, shape index: {}]   ;;  %s861_s5 = inlined_call_operand.hbm [shape: f32[16,512], index: 5, kind: output, shape index: {}]  }
   0x1   :  { %11 = vsyncpa [#allocation7], 0 }
   0x2   :  { %12 = vsyncpa [#allocation5], 0  ;;  %s790_s18 = smov [#allocation6]  }
   0x3   :  { %s30_s19 = sshll.u32 %s790_s18, 4  ;;  %s31_s19 = int_to_ptr.vmem [resolvable:$true] %s30_s19 }
   0x4   :  { %s712_s20 = scalar_lea.vmem %s31_s19, 8192  ;;  %p717_p1 = scmp.lt.s32.totalorder %s31_s19, %s31_s19 }
   0x5   :  { %p713_p0 = scmp.ne.s32.totalorder %s31_s19, %s712_s20  ;;  %p718_p2 = scmp.lt.s32.totalorder %s712_s20, %s712_s20 }
   0x7   :  { %p719_p3 = por %p718_p2, %p717_p1 }
   0x9   :  { %p720_p4 = pnand %p719_p3, %p713_p0 }
   0xb   :  { %723 = shalt.err (!%p720_p4)
}
   0xc   :  { %s791_s21 = smov 128   ;;  %s792_s22 = smov 8  }
   0xd   :  { %36 = dma.hbm_to_vmem [thread:$0]  %s857_s1, 8192, %s31_s19, [#allocation7], %s791_s21, %s791_s21, %s792_s22  }
   0xe   :  { %s793_s25 = smov [#allocation3]  }
   0xf   :  { %s18_s26 = sshll.u32 %s793_s25, 4  ;;  %s19_s26 = int_to_ptr.vmem [resolvable:$true] %s18_s26 }
  0x10   :  { %s732_s27 = scalar_lea.vmem %s19_s26, 1024  ;;  %p737_p6 = scmp.lt.s32.totalorder %s19_s26, %s19_s26 }
  0x11   :  { %p733_p5 = scmp.ne.s32.totalorder %s19_s26, %s732_s27  ;;  %p738_p7 = scmp.lt.s32.totalorder %s732_s27, %s732_s27 }
  0x13   :  { %p739_p8 = por %p738_p7, %p737_p6 }
  0x15   :  { %p740_p9 = pnand %p739_p8, %p733_p5 }
  0x17   :  { %743 = shalt.err (!%p740_p9)
}
  0x18   :  { %s794_s28 = smov 512   ;;  %s795_s29 = smov 32  }
  0x19   :  { %24 = dma.hbm_to_vmem [thread:$0]  %s856_s0, 1024, %s19_s26, [#allocation4], %s794_s28, %s794_s28, %s795_s29  }
  0x1a   :  { %s796_s1 = smov [#allocation8]  }
  0x1b   :  { %s44_s7 = sshll.u32 %s796_s1, 4  ;;  %s45_s7 = int_to_ptr.vmem [resolvable:$true] %s44_s7 }
  0x1c   :  { %s752_s8 = scalar_lea.vmem %s45_s7, 8192  ;;  %p757_p11 = scmp.lt.s32.totalorder %s45_s7, %s45_s7 }
  0x1d   :  { %p753_p10 = scmp.ne.s32.totalorder %s45_s7, %s752_s8  ;;  %p758_p12 = scmp.lt.s32.totalorder %s752_s8, %s752_s8 }
  0x1f   :  { %p759_p13 = por %p758_p12, %p757_p11 }
  0x21   :  { %p760_p0 = pnand %p759_p13, %p753_p10 }
  0x23   :  { %763 = shalt.err (!%p760_p0)
}
  0x24   :  { %50 = dma.hbm_to_vmem [thread:$0]  %s859_s3, 8192, %s45_s7, [#allocation7], %s794_s28, %s794_s28, %s795_s29  }
  0x25   :  { %784 = dma.done.wait [#allocation4], 1024  }
  0x26   :  { %785 = vsyncadd [#allocation4], 4294966272 }
  0x27   :  { %786 = dma.done.wait [#allocation7], 16384  }
  0x28   :  { %787 = vsyncadd [#allocation7], 4294950912  ;;  %v135_v0 = vld [vmem:[#allocation6 + $0xf8] sm:$0xff]  ;;  %v134_v4 = vld [vmem:[#allocation6 + $0xf0] sm:$0xff]  ;;  %s798_s12 = smov [#allocation9]  }
  0x29   :  { %v167_v1 = vld [vmem:[#allocation6 + $0x1f8] sm:$0xff]  ;;  %615 = vmatprep.subr.mxu0 %v135_v0  ;;  %v166_v5 = vld [vmem:[#allocation6 + $0x1f0] sm:$0xff]  ;;  %v133_v8 = vld [vmem:[#allocation6 + $0xe8] sm:$0xff] }
  0x2a   :  { %v119_v2 = vld [vmem:[#allocation6 + $0x78] sm:$0xff]  ;;  %653 = vmatprep.subr.mxu1 %v167_v1  ;;  %v118_v6 = vld [vmem:[#allocation6 + $0x70] sm:$0xff]  ;;  %v165_v9 = vld [vmem:[#allocation6 + $0x1e8] sm:$0xff] }
  0x2b   :  { %v151_v3 = vld [vmem:[#allocation6 + $0x178] sm:$0xff]  ;;  %616 = vmatpush3.msra.mxu0 %v119_v2  ;;  %v150_v7 = vld [vmem:[#allocation6 + $0x170] sm:$0xff]  ;;  %v117_v10 = vld [vmem:[#allocation6 + $0x68] sm:$0xff] }
  0x2c   :  { %654 = vmatpush3.msra.mxu1 %v151_v3  ;;  %617 = vmatprep.subr.mxu0 %v134_v4  ;;  %v149_v11 = vld [vmem:[#allocation6 + $0x168] sm:$0xff]  ;;  %v132_v12 = vld [vmem:[#allocation6 + $0xe0] sm:$0xff]  ;;  %v131_v16 = vld [vmem:[#allocation6 + $0xd8] sm:$0xff] }
  0x2d   :  { %655 = vmatprep.subr.mxu1 %v166_v5  ;;  %618 = vmatpush3.msra.mxu0 %v118_v6  ;;  %v164_v13 = vld [vmem:[#allocation6 + $0x1e0] sm:$0xff]  ;;  %v163_v17 = vld [vmem:[#allocation6 + $0x1d8] sm:$0xff]  ;;  %v130_v20 = vld [vmem:[#allocation6 + $0xd0] sm:$0xff] }
  0x2e   :  { %656 = vmatpush3.msra.mxu1 %v150_v7  ;;  %619 = vmatprep.subr.mxu0 %v133_v8  ;;  %v116_v14 = vld [vmem:[#allocation6 + $0x60] sm:$0xff]  ;;  %v115_v18 = vld [vmem:[#allocation6 + $0x58] sm:$0xff]  ;;  %v162_v21 = vld [vmem:[#allocation6 + $0x1d0] sm:$0xff] }
  0x2f   :  { %657 = vmatprep.subr.mxu1 %v165_v9  ;;  %v148_v15 = vld [vmem:[#allocation6 + $0x160] sm:$0xff]  ;;  %620 = vmatpush3.msra.mxu0 %v117_v10  ;;  %v147_v19 = vld [vmem:[#allocation6 + $0x158] sm:$0xff]  ;;  %v114_v22 = vld [vmem:[#allocation6 + $0x50] sm:$0xff] }
  0x30   :  { %658 = vmatpush3.msra.mxu1 %v149_v11  ;;  %621 = vmatprep.subr.mxu0 %v132_v12  ;;  %v146_v23 = vld [vmem:[#allocation6 + $0x150] sm:$0xff]  ;;  %v129_v24 = vld [vmem:[#allocation6 + $0xc8] sm:$0xff]  ;;  %v128_v28 = vld [vmem:[#allocation6 + $0xc0] sm:$0xff] }
  0x31   :  { %659 = vmatprep.subr.mxu1 %v164_v13  ;;  %622 = vmatpush3.msra.mxu0 %v116_v14  ;;  %v161_v25 = vld [vmem:[#allocation6 + $0x1c8] sm:$0xff]  ;;  %v160_v29 = vld [vmem:[#allocation6 + $0x1c0] sm:$0xff]  ;;  %v127_v32 = vld [vmem:[#allocation6 + $0xb8] sm:$0xff] }
  0x32   :  { %660 = vmatpush3.msra.mxu1 %v148_v15  ;;  %623 = vmatprep.subr.mxu0 %v131_v16  ;;  %v113_v26 = vld [vmem:[#allocation6 + $0x48] sm:$0xff]  ;;  %v112_v30 = vld [vmem:[#allocation6 + $0x40] sm:$0xff]  ;;  %v159_v33 = vld [vmem:[#allocation6 + $0x1b8] sm:$0xff] }
  0x33   :  { %661 = vmatprep.subr.mxu1 %v163_v17  ;;  %624 = vmatpush3.msra.mxu0 %v115_v18  ;;  %v145_v27 = vld [vmem:[#allocation6 + $0x148] sm:$0xff]  ;;  %v144_v31 = vld [vmem:[#allocation6 + $0x140] sm:$0xff]  ;;  %v111_v34 = vld [vmem:[#allocation6 + $0x38] sm:$0xff] }
  0x34   :  { %662 = vmatpush3.msra.mxu1 %v147_v19  ;;  %625 = vmatprep.subr.mxu0 %v130_v20  ;;  %v143_v35 = vld [vmem:[#allocation6 + $0x138] sm:$0xff]  ;;  %v126_v36 = vld [vmem:[#allocation6 + $0xb0] sm:$0xff]  ;;  %v125_v40 = vld [vmem:[#allocation6 + $0xa8] sm:$0xff] }
  0x35   :  { %663 = vmatprep.subr.mxu1 %v162_v21  ;;  %626 = vmatpush3.msra.mxu0 %v114_v22  ;;  %v158_v37 = vld [vmem:[#allocation6 + $0x1b0] sm:$0xff]  ;;  %v157_v41 = vld [vmem:[#allocation6 + $0x1a8] sm:$0xff]  ;;  %v124_v44 = vld [vmem:[#allocation6 + $0xa0] sm:$0xff] }
  0x36   :  { %664 = vmatpush3.msra.mxu1 %v146_v23  ;;  %627 = vmatprep.subr.mxu0 %v129_v24  ;;  %v110_v38 = vld [vmem:[#allocation6 + $0x30] sm:$0xff]  ;;  %v109_v42 = vld [vmem:[#allocation6 + $0x28] sm:$0xff]  ;;  %v156_v45 = vld [vmem:[#allocation6 + $0x1a0] sm:$0xff] }
  0x37   :  { %665 = vmatprep.subr.mxu1 %v161_v25  ;;  %628 = vmatpush3.msra.mxu0 %v113_v26  ;;  %v142_v39 = vld [vmem:[#allocation6 + $0x130] sm:$0xff]  ;;  %v141_v43 = vld [vmem:[#allocation6 + $0x128] sm:$0xff]  ;;  %v108_v46 = vld [vmem:[#allocation6 + $0x20] sm:$0xff] }
  0x38   :  { %666 = vmatpush3.msra.mxu1 %v145_v27  ;;  %629 = vmatprep.subr.mxu0 %v128_v28  ;;  %v140_v47 = vld [vmem:[#allocation6 + $0x120] sm:$0xff]  ;;  %v123_v48 = vld [vmem:[#allocation6 + $0x98] sm:$0xff]  ;;  %v122_v52 = vld [vmem:[#allocation6 + $0x90] sm:$0xff] }
  0x39   :  { %667 = vmatprep.subr.mxu1 %v160_v29  ;;  %630 = vmatpush3.msra.mxu0 %v112_v30  ;;  %v155_v49 = vld [vmem:[#allocation6 + $0x198] sm:$0xff]  ;;  %v154_v53 = vld [vmem:[#allocation6 + $0x190] sm:$0xff]  ;;  %v121_v56 = vld [vmem:[#allocation6 + $0x88] sm:$0xff] }
  0x3a   :  { %668 = vmatpush3.msra.mxu1 %v144_v31  ;;  %631 = vmatprep.subr.mxu0 %v127_v32  ;;  %v107_v50 = vld [vmem:[#allocation6 + $0x18] sm:$0xff]  ;;  %v106_v54 = vld [vmem:[#allocation6 + $0x10] sm:$0xff]  ;;  %v153_v57 = vld [vmem:[#allocation6 + $0x188] sm:$0xff] }
  0x3b   :  { %669 = vmatprep.subr.mxu1 %v159_v33  ;;  %632 = vmatpush3.msra.mxu0 %v111_v34  ;;  %v139_v51 = vld [vmem:[#allocation6 + $0x118] sm:$0xff]  ;;  %v138_v55 = vld [vmem:[#allocation6 + $0x110] sm:$0xff]  ;;  %v105_v58 = vld [vmem:[#allocation6 + $0x8] sm:$0xff] }
  0x3c   :  { %670 = vmatpush3.msra.mxu1 %v143_v35  ;;  %633 = vmatprep.subr.mxu0 %v126_v36  ;;  %v137_v59 = vld [vmem:[#allocation6 + $0x108] sm:$0xff]  ;;  %v120_v60 = vld [vmem:[#allocation6 + $0x80] sm:$0xff]  ;;  %v99_v1 = vld [vmem:[#allocation3 + $0x18] sm:$0xff] }
  0x3d   :  { %671 = vmatprep.subr.mxu1 %v158_v37  ;;  %634 = vmatpush3.msra.mxu0 %v110_v38  ;;  %v152_v61 = vld [vmem:[#allocation6 + $0x180] sm:$0xff]  ;;  %v97_v63 = vld [vmem:[#allocation3 + $0x8] sm:$0xff]  ;;  %v98_v3 = vld [vmem:[#allocation3 + $0x10] sm:$0xff] }
  0x3e   :  { %672 = vmatpush3.msra.mxu1 %v142_v39  ;;  %635 = vmatprep.subr.mxu0 %v125_v40  ;;  %v104_v62 = vld [vmem:[#allocation6] sm:$0xff]  ;;  %v101_v4 = vld [vmem:[#allocation3 + $0x28] sm:$0xff]  ;;  %v103_v5 = vld [vmem:[#allocation3 + $0x38] sm:$0xff] }
  0x3f   :  { %673 = vmatprep.subr.mxu1 %v157_v41  ;;  %636 = vmatpush3.msra.mxu0 %v109_v42  ;;  %v136_v0 = vld [vmem:[#allocation6 + $0x100] sm:$0xff]  ;;  %v404_v6 = vld [vmem:[#allocation8 + $0x1e8] sm:$0xff]  ;;  %v406_v7 = vld [vmem:[#allocation8 + $0x1f8] sm:$0xff] }
  0x40   :  { %674 = vmatpush3.msra.mxu1 %v141_v43  ;;  %637 = vmatprep.subr.mxu0 %v124_v44  ;;  %v96_v2 = vld [vmem:[#allocation3] sm:$0xff]  ;;  %v405_v9 = vld [vmem:[#allocation8 + $0x1f0] sm:$0xff]  ;;  %v400_v12 = vld [vmem:[#allocation8 + $0x1c8] sm:$0xff] }
  0x41   :  { %675 = vmatprep.subr.mxu1 %v156_v45  ;;  %638 = vmatpush3.msra.mxu0 %v108_v46  ;;  %v403_v8 = vld [vmem:[#allocation8 + $0x1e0] sm:$0xff]  ;;  %v102_v11 = vld [vmem:[#allocation3 + $0x30] sm:$0xff]  ;;  %v402_v13 = vld [vmem:[#allocation8 + $0x1d8] sm:$0xff] }
  0x42   :  { %676 = vmatpush3.msra.mxu1 %v140_v47  ;;  %639 = vmatprep.subr.mxu0 %v123_v48  ;;  %v100_v10 = vld [vmem:[#allocation3 + $0x20] sm:$0xff]  ;;  %v401_v15 = vld [vmem:[#allocation8 + $0x1d0] sm:$0xff]  ;;  %v396_v16 = vld [vmem:[#allocation8 + $0x1a8] sm:$0xff] }
  0x43   :  { %677 = vmatprep.subr.mxu1 %v155_v49  ;;  %640 = vmatpush3.msra.mxu0 %v107_v50  ;;  %v399_v14 = vld [vmem:[#allocation8 + $0x1c0] sm:$0xff]  ;;  %v398_v17 = vld [vmem:[#allocation8 + $0x1b8] sm:$0xff]  ;;  %v397_v19 = vld [vmem:[#allocation8 + $0x1b0] sm:$0xff] }
  0x44   :  { %678 = vmatpush3.msra.mxu1 %v139_v51  ;;  %641 = vmatprep.subr.mxu0 %v122_v52  ;;  %v395_v18 = vld [vmem:[#allocation8 + $0x1a0] sm:$0xff]  ;;  %v392_v20 = vld [vmem:[#allocation8 + $0x188] sm:$0xff]  ;;  %v394_v21 = vld [vmem:[#allocation8 + $0x198] sm:$0xff] }
  0x45   :  { %679 = vmatprep.subr.mxu1 %v154_v53  ;;  %642 = vmatpush3.msra.mxu0 %v106_v54  ;;  %v391_v22 = vld [vmem:[#allocation8 + $0x180] sm:$0xff]  ;;  %v393_v23 = vld [vmem:[#allocation8 + $0x190] sm:$0xff]  ;;  %v388_v24 = vld [vmem:[#allocation8 + $0x168] sm:$0xff] }
  0x46   :  { %680 = vmatpush3.msra.mxu1 %v138_v55  ;;  %643 = vmatprep.subr.mxu0 %v121_v56  ;;  %v390_v25 = vld [vmem:[#allocation8 + $0x178] sm:$0xff]  ;;  %v387_v26 = vld [vmem:[#allocation8 + $0x160] sm:$0xff]  ;;  %v389_v27 = vld [vmem:[#allocation8 + $0x170] sm:$0xff] }
  0x47   :  { %681 = vmatprep.subr.mxu1 %v153_v57  ;;  %644 = vmatpush3.msra.mxu0 %v105_v58  ;;  %v384_v28 = vld [vmem:[#allocation8 + $0x148] sm:$0xff]  ;;  %v386_v29 = vld [vmem:[#allocation8 + $0x158] sm:$0xff]  ;;  %v383_v30 = vld [vmem:[#allocation8 + $0x140] sm:$0xff] }
  0x48   :  { %682 = vmatpush3.msra.mxu1 %v137_v59  ;;  %645 = vmatprep.subr.mxu0 %v120_v60  ;;  %v385_v31 = vld [vmem:[#allocation8 + $0x150] sm:$0xff]  ;;  %v380_v32 = vld [vmem:[#allocation8 + $0x128] sm:$0xff]  ;;  %v382_v33 = vld [vmem:[#allocation8 + $0x138] sm:$0xff] }
  0x49   :  { %683 = vmatprep.subr.mxu1 %v152_v61  ;;  %646 = vmatpush3.msra.mxu0 %v104_v62  ;;  %v379_v34 = vld [vmem:[#allocation8 + $0x120] sm:$0xff]  ;;  %v381_v35 = vld [vmem:[#allocation8 + $0x130] sm:$0xff]  ;;  %v376_v36 = vld [vmem:[#allocation8 + $0x108] sm:$0xff] }
  0x4a   :  { %239 = vmatprep.mubr.f32.mxu0 %v97_v63  ;;  %684 = vmatpush3.msra.mxu1 %v136_v0  ;;  %v378_v37 = vld [vmem:[#allocation8 + $0x118] sm:$0xff]  ;;  %v375_v38 = vld [vmem:[#allocation8 + $0x100] sm:$0xff]  ;;  %v377_v39 = vld [vmem:[#allocation8 + $0x110] sm:$0xff] }
  0x4b   :  { %314 = vmatprep.mubr.f32.mxu1 %v99_v1  ;;  %240 = vmatmul.mubr.f32.vlgmr.msra.gmra.mxu0 %v96_v2  ;;  %v372_v40 = vld [vmem:[#allocation8 + $0xe8] sm:$0xff]  ;;  %v374_v41 = vld [vmem:[#allocation8 + $0xf8] sm:$0xff]  ;;  %v371_v42 = vld [vmem:[#allocation8 + $0xe0] sm:$0xff] }
  0x4c   :  { %315 = vmatmul.mubr.f32.vlgmr.msra.gmra.mxu1 %v98_v3  ;;  %244 = vmatprep.mubr.f32.mxu0 %v101_v4  ;;  %v373_v43 = vld [vmem:[#allocation8 + $0xf0] sm:$0xff]  ;;  %v368_v44 = vld [vmem:[#allocation8 + $0xc8] sm:$0xff]  ;;  %v370_v45 = vld [vmem:[#allocation8 + $0xd8] sm:$0xff] }
  0x4d   :  { %319 = vmatprep.mubr.f32.mxu1 %v103_v5  ;;  %407 = vmatprep.subr.mxu0 %v404_v6  ;;  %v367_v46 = vld [vmem:[#allocation8 + $0xc0] sm:$0xff]  ;;  %v369_v47 = vld [vmem:[#allocation8 + $0xd0] sm:$0xff]  ;;  %v364_v48 = vld [vmem:[#allocation8 + $0xa8] sm:$0xff] }
  0x4e   :  { %484 = vmatprep.subr.mxu1 %v406_v7  ;;  %408 = vmatpush1.msra.mxu0 %v403_v8  ;;  %v366_v49 = vld [vmem:[#allocation8 + $0xb8] sm:$0xff]  ;;  %v363_v50 = vld [vmem:[#allocation8 + $0xa0] sm:$0xff]  ;;  %v365_v51 = vld [vmem:[#allocation8 + $0xb0] sm:$0xff]  ;;  %v797_v8 = vmov 0.0  }
  0x4f   :  { %485 = vmatpush1.msra.mxu1 %v405_v9  ;;  %245 = vmatmul.mubr.f32.gmra.mxu0 %v100_v10  ;;  %v360_v52 = vld [vmem:[#allocation8 + $0x88] sm:$0xff]  ;;  %v362_v53 = vld [vmem:[#allocation8 + $0x98] sm:$0xff]  ;;  %v359_v54 = vld [vmem:[#allocation8 + $0x80] sm:$0xff] }
  0x50   :  { %320 = vmatmul.mubr.f32.gmra.mxu1 %v102_v11  ;;  %409 = vmatprep.subr.mxu0 %v400_v12  ;;  %v361_v55 = vld [vmem:[#allocation8 + $0x90] sm:$0xff]  ;;  %v356_v56 = vld [vmem:[#allocation8 + $0x68] sm:$0xff]  ;;  %v358_v57 = vld [vmem:[#allocation8 + $0x78] sm:$0xff] }
  0x51   :  { %486 = vmatprep.subr.mxu1 %v402_v13  ;;  %410 = vmatpush1.msra.mxu0 %v399_v14  ;;  %v355_v58 = vld [vmem:[#allocation8 + $0x60] sm:$0xff]  ;;  %v357_v59 = vld [vmem:[#allocation8 + $0x70] sm:$0xff]  ;;  %v352_v60 = vld [vmem:[#allocation8 + $0x48] sm:$0xff] }
  0x52   :  { %487 = vmatpush1.msra.mxu1 %v401_v15  ;;  %411 = vmatprep.subr.mxu0 %v396_v16  ;;  %v354_v61 = vld [vmem:[#allocation8 + $0x58] sm:$0xff]  ;;  %v351_v62 = vld [vmem:[#allocation8 + $0x40] sm:$0xff]  ;;  %v353_v63 = vld [vmem:[#allocation8 + $0x50] sm:$0xff] }
  0x53   :  { %488 = vmatprep.subr.mxu1 %v398_v17  ;;  %412 = vmatpush1.msra.mxu0 %v395_v18  ;;  %v348_v0 = vld [vmem:[#allocation8 + $0x28] sm:$0xff]  ;;  %v350_v1 = vld [vmem:[#allocation8 + $0x38] sm:$0xff]  ;;  %v347_v2 = vld [vmem:[#allocation8 + $0x20] sm:$0xff] }
  0x54   :  { %489 = vmatpush1.msra.mxu1 %v397_v19  ;;  %413 = vmatprep.subr.mxu0 %v392_v20  ;;  %v349_v3 = vld [vmem:[#allocation8 + $0x30] sm:$0xff]  ;;  %v344_v4 = vld [vmem:[#allocation8 + $0x8] sm:$0xff]  ;;  %v346_v5 = vld [vmem:[#allocation8 + $0x18] sm:$0xff] }
  0x55   :  { %490 = vmatprep.subr.mxu1 %v394_v21  ;;  %414 = vmatpush1.msra.mxu0 %v391_v22  ;;  %v343_v6 = vld [vmem:[#allocation8] sm:$0xff]  ;;  %v345_v7 = vld [vmem:[#allocation8 + $0x10] sm:$0xff] }
  0x56   :  { %491 = vmatpush1.msra.mxu1 %v393_v23  ;;  %415 = vmatprep.subr.mxu0 %v388_v24  ;;  %v614_v11 = vld [vmem:[%s858_s2] ss:$0 sm:$0xff] }
  0x57   :  { %492 = vmatprep.subr.mxu1 %v390_v25  ;;  %416 = vmatpush1.msra.mxu0 %v387_v26 }
  0x58   :  { %493 = vmatpush1.msra.mxu1 %v389_v27  ;;  %417 = vmatprep.subr.mxu0 %v384_v28 }
  0x59   :  { %494 = vmatprep.subr.mxu1 %v386_v29  ;;  %418 = vmatpush1.msra.mxu0 %v383_v30 }
  0x5a   :  { %495 = vmatpush1.msra.mxu1 %v385_v31  ;;  %419 = vmatprep.subr.mxu0 %v380_v32 }
  0x5b   :  { %496 = vmatprep.subr.mxu1 %v382_v33  ;;  %420 = vmatpush1.msra.mxu0 %v379_v34 }
  0x5c   :  { %497 = vmatpush1.msra.mxu1 %v381_v35  ;;  %421 = vmatprep.subr.mxu0 %v376_v36  ;;  %v68_v36 = vlaneseq }
  0x5d   :  { %498 = vmatprep.subr.mxu1 %v378_v37  ;;  %422 = vmatpush1.msra.mxu0 %v375_v38 }
  0x5e   :  { %499 = vmatpush1.msra.mxu1 %v377_v39  ;;  %423 = vmatprep.subr.mxu0 %v372_v40  ;;  %v69_v37 = vshrl.u32 %v68_v36, 7  ;;  %v66_v40 = vld [vmem:[%s860_s4] sm:$0xf]  ;;  %s601_s4 = sshll.u32 %s798_s12, 4  ;;  %s602_s4 = int_to_ptr.vmem [resolvable:$true] %s601_s4 }
  0x5f   :  { %500 = vmatprep.subr.mxu1 %v374_v41  ;;  %424 = vmatpush1.msra.mxu0 %v371_v42  ;;  %s764_s13 = scalar_lea.vmem %s602_s4, 1024  ;;  %p769_p2 = scmp.lt.s32.totalorder %s602_s4, %s602_s4 }
  0x60   :  { %501 = vmatpush1.msra.mxu1 %v373_v43  ;;  %425 = vmatprep.subr.mxu0 %v368_v44  ;;  %v70_v38 = vsub.s32 0, %v69_v37  ;;  %v78_v39 = vsub.s32 2, %v69_v37  ;;  %v74_v41 = vsub.s32 1, %v69_v37  ;;  %v82_v42 = vsub.s32 3, %v69_v37  ;;  %p765_p1 = scmp.ne.s32.totalorder %s602_s4, %s764_s13  ;;  %p770_p3 = scmp.lt.s32.totalorder %s764_s13, %s764_s13 }
  0x61   :  { %502 = vmatprep.subr.mxu1 %v370_v45  ;;  %426 = vmatpush1.msra.mxu0 %v367_v46 }
  0x62   :  { %503 = vmatpush1.msra.mxu1 %v369_v47  ;;  %427 = vmatprep.subr.mxu0 %v364_v48  ;;  %v71_v43 = vrot.slane %v66_v40, %v70_v38  ;;  %v79_v44 = vrot.slane %v66_v40, %v78_v39  ;;  %v75_v45 = vrot.slane %v66_v40, %v74_v41  ;;  %p771_p4 = por %p770_p3, %p769_p2 }
  0x63   :  { %504 = vmatprep.subr.mxu1 %v366_v49  ;;  %428 = vmatpush1.msra.mxu0 %v363_v50  ;;  %v83_v46 = vrot.slane %v66_v40, %v82_v42 }
  0x64   :  { %505 = vmatpush1.msra.mxu1 %v365_v51  ;;  %429 = vmatprep.subr.mxu0 %v360_v52  ;;  %p772_p5 = pnand %p771_p4, %p765_p1 }
  0x65   :  { %506 = vmatprep.subr.mxu1 %v362_v53  ;;  %430 = vmatpush1.msra.mxu0 %v359_v54 }
  0x66   :  { %507 = vmatpush1.msra.mxu1 %v361_v55  ;;  %431 = vmatprep.subr.mxu0 %v356_v56 }
  0x67   :  { %508 = vmatprep.subr.mxu1 %v358_v57  ;;  %432 = vmatpush1.msra.mxu0 %v355_v58 }
  0x68   :  { %509 = vmatpush1.msra.mxu1 %v357_v59  ;;  %433 = vmatprep.subr.mxu0 %v352_v60 }
  0x69   :  { %510 = vmatprep.subr.mxu1 %v354_v61  ;;  %434 = vmatpush1.msra.mxu0 %v351_v62 }
  0x6a   :  { %511 = vmatpush1.msra.mxu1 %v353_v63  ;;  %435 = vmatprep.subr.mxu0 %v348_v0 }
  0x6b   :  { %512 = vmatprep.subr.mxu1 %v350_v1  ;;  %436 = vmatpush1.msra.mxu0 %v347_v2 }
  0x6c   :  { %513 = vmatpush1.msra.mxu1 %v349_v3  ;;  %437 = vmatprep.subr.mxu0 %v344_v4 }
  0x6d   :  { %514 = vmatprep.subr.mxu1 %v346_v5  ;;  %438 = vmatpush1.msra.mxu0 %v343_v6 }
  0x6e   :  { %471 = vmatprep.mubr.f32.mxu0 %v797_v8  ;;  %515 = vmatpush1.msra.mxu1 %v345_v7 }
  0x6f   :  { %548 = vmatprep.mubr.f32.mxu1 %v797_v8 }
 0x10b   :  { %v647_v9 = vpop.f32.mrf.mxu0 }
 0x10c   :  { %v685_v10 = vpop.f32.mrf.mxu1 }
 0x10d   :  { %v648_v12 = vpop.f32.mrf.mxu0 }
 0x10e   :  { %v686_v13 = vpop.f32.mrf.mxu1  ;;  %v649_v14 = vadd.f32 %v648_v12, %v647_v9 }
 0x10f   :  { %v650_v15 = vpop.f32.mrf.mxu0  ;;  %v687_v18 = vadd.f32 %v686_v13, %v685_v10 }
 0x110   :  { %v688_v16 = vpop.f32.mrf.mxu1  ;;  %v242_v17 = vadd.f32 %v649_v14, %v614_v11 }
 0x111   :  { %v651_v19 = vpop.f32.mrf.mxu0 }
 0x112   :  { %v689_v20 = vpop.f32.mrf.mxu1  ;;  %v317_v21 = vadd.f32 %v687_v18, %v242_v17  ;;  %v652_v22 = vadd.f32 %v651_v19, %v650_v15 }
 0x113   :  { %v690_v25 = vadd.f32 %v689_v20, %v688_v16 }
 0x114   :  { %v327_v23 = vmul.f32 0.70710677, %v317_v21  ;;  %v247_v24 = vadd.f32 %v652_v22, %v614_v11  ;;  %v325_v29 = vmul.f32 0.5, %v317_v21 }
 0x116   :  { %700 = verf.f32 %v327_v23  ;;  %v322_v26 = vadd.f32 %v690_v25, %v247_v24 }
 0x118   :  { %v328_v27 = vmul.f32 0.70710677, %v322_v26  ;;  %v326_v33 = vmul.f32 0.5, %v322_v26 }
 0x11a   :  { %702 = verf.f32 %v328_v27 }
 0x123   :  { %v701_v28 = vpop.eup %700 }
 0x124   :  { %v331_v30 = vadd.f32 1.0, %v701_v28 }
 0x126   :  { %v333_v31 = vmul.f32 %v331_v30, %v325_v29 }
 0x127   :  { %v703_v32 = vpop.eup %702 }
 0x128   :  { %472 = vmatmul.mubr.f32.vlgmr.msra.gmra.mxu0 %v333_v31  ;;  %549 = vmatmul.mubr.f32.vlgmr.msra.gmra.mxu1 %v333_v31  ;;  %v332_v34 = vadd.f32 1.0, %v703_v32 }
 0x129   :  { %477 = vmatprep.mubr.f32.mxu0 %v797_v8  ;;  %554 = vmatprep.mubr.f32.mxu1 %v797_v8 }
 0x12a   :  { %v334_v35 = vmul.f32 %v332_v34, %v326_v33 }
 0x12c   :  { %478 = vmatmul.mubr.f32.gmra.mxu0 %v334_v35  ;;  %555 = vmatmul.mubr.f32.gmra.mxu1 %v334_v35 }
 0x1e8   :  { %v473_v47 = vpop.f32.mrf.mxu0  ;;  %v550_v48 = vpop.f32.mrf.mxu1 }
 0x1e9   :  { %v561_v49 = vadd.f32 %v473_v47, %v71_v43  ;;  %v563_v50 = vadd.f32 %v550_v48, %v79_v44 }
 0x1ea   :  { %v475_v51 = vpop.f32.mrf.mxu0  ;;  %v552_v52 = vpop.f32.mrf.mxu1 }
 0x1eb   :  { %588 = vst [vmem:[#allocation9] sm:$0xff] %v561_v49  ;;  %590 = vst [vmem:[#allocation9 + $0x10] sm:$0xff] %v563_v50  ;;  %v562_v53 = vadd.f32 %v475_v51, %v75_v45  ;;  %v564_v54 = vadd.f32 %v552_v52, %v83_v46 }
 0x1ec   :  { %v479_v55 = vpop.f32.mrf.mxu0  ;;  %v556_v56 = vpop.f32.mrf.mxu1 }
 0x1ed   :  { %589 = vst [vmem:[#allocation9 + $0x8] sm:$0xff] %v562_v53  ;;  %591 = vst [vmem:[#allocation9 + $0x18] sm:$0xff] %v564_v54  ;;  %v565_v57 = vadd.f32 %v479_v55, %v71_v43  ;;  %v567_v58 = vadd.f32 %v556_v56, %v79_v44 }
 0x1ee   :  { %v481_v59 = vpop.f32.mrf.mxu0  ;;  %v558_v60 = vpop.f32.mrf.mxu1 }
 0x1ef   :  { %592 = vst [vmem:[#allocation9 + $0x20] sm:$0xff] %v565_v57  ;;  %594 = vst [vmem:[#allocation9 + $0x30] sm:$0xff] %v567_v58  ;;  %v566_v61 = vadd.f32 %v481_v59, %v75_v45  ;;  %v568_v62 = vadd.f32 %v558_v60, %v83_v46 }
 0x1f1   :  { %593 = vst [vmem:[#allocation9 + $0x28] sm:$0xff] %v566_v61  ;;  %595 = vst [vmem:[#allocation9 + $0x38] sm:$0xff] %v568_v62 }
 0x1f2   :  { %775 = shalt.err (!%p772_p5)
}
 0x1f3   :  { %607 = dma.vmem_to_hbm [thread:$0]  %s602_s4, 1024, %s861_s5, [#allocation5], %s794_s28, %s794_s28, %s795_s29  }
 0x1f4   :  { %788 = dma.done.wait [#allocation5], 1024  }
 0x1f5   :  { %789 = vsyncadd [#allocation5], 4294966272 }
 0x1f6   :  { %611 = vsyncpa [#allocation4], 1 }
 0x1f7   :  { %612 = vsyncpa [#allocation7], 1 }
 0x1f8   :  { %613 = vsyncpa [#allocation5], 1 }

</bundles_post_ra>
